<compile_context>
chip_gen: v6e
topology: v6e:2x2x1
jax: 0.10.0
libtpu: 0.0.40
codegen_flags: <defaults>
</compile_context>

<pallas_src>
import jax
import jax.numpy as jnp
from jax.experimental import pallas as pl
from jax.experimental.pallas import tpu as pltpu


def mlp_kernel(xT_ref, w1T_ref, b1_ref, w2T_ref, b2_ref, w3_ref, b3_ref, o_ref):
    """Fused transposed MLP block.

    xT_ref : (2, TB)  x transposed (batch on lanes)
    w1T_ref: (F, 2)   fc1 weight as (out, in)
    b1_ref : (F, 1)
    w2T_ref: (F, F)   fc2 weight as (out, in)
    b2_ref : (F, 1)
    w3_ref : (F, 1)   fc3 weight as (in, out), out == 1
    b3_ref : (1, 1)   scalar in SMEM
    o_ref  : (1, TB)  sigmoid(fc3(...)) with batch on lanes (lane-dense store)
    """
    xT = xT_ref[...]
    w1T = w1T_ref[...]

    # fc1 (K == 2) on the VPU: two broadcast FMAs, no MXU push/pop for a 2-deep K.
    h1 = w1T[:, 0:1] * xT[0:1, :] + w1T[:, 1:2] * xT[1:2, :] + b1_ref[...]
    h1 = jnp.maximum(h1, 0.0)

    # fc2 on the MXU: (F, F) @ (F, TB) with f32 accumulation, batch stays on lanes.
    h2 = jnp.dot(w2T_ref[...], h1, preferred_element_type=jnp.float32) + b2_ref[...]
    h2 = jnp.maximum(h2, 0.0)

    # fc3 (N == 1): broadcast multiply + sublane reduction (XLU) keeps batch on
    # lanes and avoids both an M=1 matmul and a lane-width-1 masked output store.
    z = jnp.sum(w3_ref[...] * h2, axis=0, keepdims=True) + b3_ref[0, 0]
    o_ref[...] = jax.nn.sigmoid(z).astype(o_ref.dtype)


def mlp_forward(x, w1, b1, w2, b2, w3, b3, *, tb=1024):
    """x: (B, 2); weights in PyTorch-Linear-transposed (in, out) convention."""
    B, _ = x.shape
    F = w1.shape[1]

    # Layout plumbing in the wrapper: present everything with batch on lanes.
    xT = x.T                      # (2, B)
    w1T = w1.T                    # (F, 2)
    b1c = b1.reshape(F, 1)        # (F, 1)
    w2T = w2.T                    # (F, F)
    b2c = b2.reshape(F, 1)        # (F, 1)
    w3c = w3.reshape(F, 1)        # (F, 1)
    b3s = b3.reshape(1, 1)        # (1, 1) scalar -> SMEM

    vmem = pl.BlockSpec(memory_space=pltpu.MemorySpace.VMEM)
    smem = pl.BlockSpec(memory_space=pltpu.MemorySpace.SMEM)

    if B <= tb:
        # Entire problem is a handful of vregs: single invocation, no grid,
        # no per-step pipeline overhead, no double-buffered weight blocks.
        out_t = pl.pallas_call(
            mlp_kernel,
            out_shape=jax.ShapeDtypeStruct((1, B), jnp.float32),
            in_specs=[vmem, vmem, vmem, vmem, vmem, vmem, smem],
            out_specs=vmem,
        )(xT, w1T, b1c, w2T, b2c, w3c, b3s)
        return out_t.reshape(B, 1)

    # Large-batch path: big lane-aligned batch tiles; weights are grid-invariant
    # full blocks (constant index_map -> fetched once, no re-DMA between steps).
    bp = tb * pl.cdiv(B, tb)
    if bp != B:
        xT = jnp.pad(xT, ((0, 0), (0, bp - B)))
    num_steps = bp // tb
    out_t = pl.pallas_call(
        mlp_kernel,
        out_shape=jax.ShapeDtypeStruct((1, bp), jnp.float32),
        grid_spec=pltpu.PrefetchScalarGridSpec(
            num_scalar_prefetch=0,
            grid=(num_steps,),
            in_specs=[
                pl.BlockSpec((2, tb), lambda i: (0, i)),   # x tile, batch on lanes
                pl.BlockSpec((F, 2), lambda i: (0, 0)),    # W1^T (invariant)
                pl.BlockSpec((F, 1), lambda i: (0, 0)),    # b1
                pl.BlockSpec((F, F), lambda i: (0, 0)),    # W2^T
                pl.BlockSpec((F, 1), lambda i: (0, 0)),    # b2
                pl.BlockSpec((F, 1), lambda i: (0, 0)),    # W3
                smem,                                      # b3 scalar in SMEM
            ],
            out_specs=pl.BlockSpec((1, tb), lambda i: (0, i)),
        ),
        compiler_params=pltpu.CompilerParams(
            # Only bother sharding across cores when there is real work per core.
            dimension_semantics=("parallel",) if num_steps >= 16 else ("arbitrary",),
        ),
    )(xT, w1T, b1c, w2T, b2c, w3c, b3s)
    return out_t[:, :B].reshape(B, 1)


def init_params(key, num_features=64):
    """Deterministic PyTorch-style Linear init: U(-1/sqrt(fan_in), 1/sqrt(fan_in))."""
    ks = jax.random.split(key, 6)

    def linear(kw, kb, fan_in, fan_out):
        bound = 1.0 / jnp.sqrt(fan_in)
        w = jax.random.uniform(kw, (fan_in, fan_out), jnp.float32, -bound, bound)
        b = jax.random.uniform(kb, (1, fan_out), jnp.float32, -bound, bound)
        return w, b

    w1, b1 = linear(ks[0], ks[1], 2, num_features)
    w2, b2 = linear(ks[2], ks[3], num_features, num_features)
    w3, b3 = linear(ks[4], ks[5], num_features, 1)
    return w1, b1, w2, b2, w3, b3


if __name__ == "__main__":
    key = jax.random.PRNGKey(0)
    k_x, k_p = jax.random.split(key)

    B = 16                       # batch
    num_features = 64
    x = jax.random.normal(k_x, (B, 2), jnp.float32)

    w1, b1, w2, b2, w3, b3 = init_params(k_p, num_features)

    out = jax.block_until_ready(mlp_forward(x, w1, b1, w2, b2, w3, b3))

    # Reference check in plain JAX (same math as the PyTorch forward).
    h1 = jnp.maximum(x @ w1 + b1, 0.0)
    h2 = jnp.maximum(h1 @ w2 + b2, 0.0)
    ref = jax.nn.sigmoid(h2 @ w3 + b3)
    assert out.shape == (B, 1)
    assert jnp.allclose(out, ref, atol=1e-5, rtol=1e-5)

    print("KERNEL_OK")
</pallas_src>

<mosaic_0001>
module attributes {stable_mosaic.version = 11 : i64} {
  func.func @mlp_kernel(%arg0: memref<2x16xf32, #tpu.memory_space<vmem>>, %arg1: memref<64x2xf32, #tpu.memory_space<vmem>>, %arg2: memref<64x1xf32, #tpu.memory_space<vmem>>, %arg3: memref<64x64xf32, #tpu.memory_space<vmem>>, %arg4: memref<64x1xf32, #tpu.memory_space<vmem>>, %arg5: memref<64x1xf32, #tpu.memory_space<vmem>>, %arg6: memref<1x1xf32, #tpu.memory_space<smem>>, %arg7: memref<1x16xf32, #tpu.memory_space<vmem>>) attributes {dimension_semantics = [], scalar_prefetch = 0 : i64, scratch_operands = 0 : i64, tpu.core_type = #tpu.core_type<tc>} {
    %c0 = arith.constant 0 : index
    %c0_0 = arith.constant 0 : index
    %0 = vector.load %arg0[%c0, %c0_0] : memref<2x16xf32, #tpu.memory_space<vmem>>, vector<2x16xf32>
    %c0_1 = arith.constant 0 : index
    %c0_2 = arith.constant 0 : index
    %1 = vector.load %arg1[%c0_1, %c0_2] : memref<64x2xf32, #tpu.memory_space<vmem>>, vector<64x2xf32>
    %2 = vector.extract_strided_slice %1 {offsets = [0, 0], sizes = [64, 1], strides = [1, 1]} : vector<64x2xf32> to vector<64x1xf32>
    %3 = vector.extract_strided_slice %0 {offsets = [0, 0], sizes = [1, 16], strides = [1, 1]} : vector<2x16xf32> to vector<1x16xf32>
    %4 = vector.broadcast %2 : vector<64x1xf32> to vector<64x16xf32>
    %5 = vector.broadcast %3 : vector<1x16xf32> to vector<64x16xf32>
    %6 = arith.mulf %4, %5 : vector<64x16xf32>
    %7 = vector.extract_strided_slice %1 {offsets = [0, 1], sizes = [64, 1], strides = [1, 1]} : vector<64x2xf32> to vector<64x1xf32>
    %8 = vector.extract_strided_slice %0 {offsets = [1, 0], sizes = [1, 16], strides = [1, 1]} : vector<2x16xf32> to vector<1x16xf32>
    %9 = vector.broadcast %7 : vector<64x1xf32> to vector<64x16xf32>
    %10 = vector.broadcast %8 : vector<1x16xf32> to vector<64x16xf32>
    %11 = arith.mulf %9, %10 : vector<64x16xf32>
    %12 = arith.addf %6, %11 : vector<64x16xf32>
    %c0_3 = arith.constant 0 : index
    %c0_4 = arith.constant 0 : index
    %13 = vector.load %arg2[%c0_3, %c0_4] : memref<64x1xf32, #tpu.memory_space<vmem>>, vector<64x1xf32>
    %14 = vector.broadcast %13 : vector<64x1xf32> to vector<64x16xf32>
    %15 = arith.addf %12, %14 : vector<64x16xf32>
    %cst = arith.constant 0.000000e+00 : f32
    %16 = vector.broadcast %cst : f32 to vector<64x16xf32>
    %17 = arith.maximumf %15, %16 : vector<64x16xf32>
    %c0_5 = arith.constant 0 : index
    %c0_6 = arith.constant 0 : index
    %18 = vector.load %arg3[%c0_5, %c0_6] : memref<64x64xf32, #tpu.memory_space<vmem>>, vector<64x64xf32>
    %cst_7 = arith.constant dense<0.000000e+00> : vector<64x16xf32>
    %19 = tpu.matmul %18, %17, %cst_7 {dimension_numbers = #tpu.dot_dimension_numbers<[1], [0], [0], [1], [0, 0, 1, 1], [], []>} : vector<64x64xf32>, vector<64x16xf32>, vector<64x16xf32> -> vector<64x16xf32>
    %c0_8 = arith.constant 0 : index
    %c0_9 = arith.constant 0 : index
    %20 = vector.load %arg4[%c0_8, %c0_9] : memref<64x1xf32, #tpu.memory_space<vmem>>, vector<64x1xf32>
    %21 = vector.broadcast %20 : vector<64x1xf32> to vector<64x16xf32>
    %22 = arith.addf %19, %21 : vector<64x16xf32>
    %cst_10 = arith.constant 0.000000e+00 : f32
    %23 = vector.broadcast %cst_10 : f32 to vector<64x16xf32>
    %24 = arith.maximumf %22, %23 : vector<64x16xf32>
    %c0_11 = arith.constant 0 : index
    %c0_12 = arith.constant 0 : index
    %25 = vector.load %arg5[%c0_11, %c0_12] : memref<64x1xf32, #tpu.memory_space<vmem>>, vector<64x1xf32>
    %26 = vector.broadcast %25 : vector<64x1xf32> to vector<64x16xf32>
    %27 = arith.mulf %26, %24 : vector<64x16xf32>
    %cst_13 = arith.constant dense<0.000000e+00> : vector<16xf32>
    %28 = vector.multi_reduction <add>, %27, %cst_13 [0] : vector<64x16xf32> to vector<16xf32>
    %29 = vector.shape_cast %28 : vector<16xf32> to vector<1x16xf32>
    %c0_14 = arith.constant 0 : index
    %c0_15 = arith.constant 0 : index
    %30 = memref.load %arg6[%c0_14, %c0_15] : memref<1x1xf32, #tpu.memory_space<smem>>
    %31 = vector.broadcast %30 : f32 to vector<1x16xf32>
    %32 = arith.addf %29, %31 : vector<1x16xf32>
    %33 = arith.negf %32 : vector<1x16xf32>
    %34 = math.exp %33 : vector<1x16xf32>
    %cst_16 = arith.constant 1.000000e+00 : f32
    %35 = vector.broadcast %cst_16 : f32 to vector<1x16xf32>
    %36 = arith.addf %35, %34 : vector<1x16xf32>
    %37 = arith.divf %35, %36 : vector<1x16xf32>
    %c0_17 = arith.constant 0 : index
    %c0_18 = arith.constant 0 : index
    %38 = vector.load %arg7[%c0_17, %c0_18] : memref<1x16xf32, #tpu.memory_space<vmem>>, vector<1x16xf32>
    tpu.vector_store %arg7[%c0_17, %c0_18], %37 {strides = array<i32>} : memref<1x16xf32, #tpu.memory_space<vmem>>, vector<1x16xf32>,
    return
  }
}

</mosaic_0001>

<bundles_post_ra>
// kernel: tpu_custom_call.1
= control target key start
LH: loop header
LB: loop body
LE: loop exit
PB: predicated region body
PF: predicated region fallthrough
CT: control target
= control target key end

     0   :  { %v611_v2 = vmov 1   ;;  %v612_v3 = vmov 0   ;;  %s822_s0 = inlined_call_operand.vmem [shape: f32[2,16], index: 0, kind: input, shape index: {}]   ;;  %s823_s1 = inlined_call_operand.vmem [shape: f32[64,2], index: 1, kind: input, shape index: {}]   ;;  %s824_s2 = inlined_call_operand.vmem [shape: f32[64,1], index: 2, kind: input, shape index: {}]   ;;  %s825_s3 = inlined_call_operand.vmem [shape: f32[64,64], index: 3, kind: input, shape index: {}]   ;;  %s826_s4 = inlined_call_operand.vmem [shape: f32[64,1], index: 4, kind: input, shape index: {}]   ;;  %s827_s5 = inlined_call_operand.vmem [shape: f32[64,1], index: 5, kind: input, shape index: {}]   ;;  %s828_s6 = inlined_call_operand.<no memory space> [shape: f32[1,1], index: 6, kind: input, shape index: {}]   ;;  %s829_s7 = inlined_call_operand.hbm [shape: f32[1,16], index: 7, kind: output, shape index: {}]  }
   0x1   :  { %v36_v0 = vld [vmem:[%s823_s1 + $0x38] sm:$0xff]  ;;  %v35_v1 = vld [vmem:[%s823_s1 + $0x30] sm:$0xff]  ;;  %574 = vset.pattern.permute.xlu0 %v611_v2  ;;  %575 = vset.pattern.permute.xlu1 %v612_v3  ;;  %v34_v4 = vld [vmem:[%s823_s1 + $0x28] sm:$0xff] }
   0x2   :  { %118 = vperm.xlu0 %574, %v36_v0   ;;  %69 = vperm.xlu1 %575, %v35_v1   ;;  %v31_v5 = vld [vmem:[%s823_s1 + $0x10] sm:$0xff]  ;;  %v30_v6 = vld [vmem:[%s823_s1 + $0x8] sm:$0xff] }
   0x6   :  { %576 = vset.pattern.permute.xlu1 %v611_v2  ;;  %110 = vperm.xlu0 %574, %v34_v4  }
   0x7   :  { %114 = vperm.xlu1 %576, %v35_v1  }
   0xa   :  { %98 = vperm.xlu0 %574, %v31_v5  }
   0xb   :  { %577 = vset.pattern.permute.xlu1 %v612_v3 }
   0xc   :  { %13 = vsyncpa [#allocation4], 0  ;;  %64 = vperm.xlu1 %577, %v34_v4   ;;  %v148_v7 = vld [vmem:[%s824_s2 + $0x38] sm:$0xff]  ;;  %v33_v8 = vld [vmem:[%s823_s1 + $0x20] sm:$0xff]  ;;  %vm261_vm0 = vcmask 523264   ;;  %v77_v38 = vlaneseq  ;;  %vm455_vm1 = vcmask 130048  }
   0xd   :  { %v147_v9 = vld [vmem:[%s824_s2 + $0x30] sm:$0xff]  ;;  %v32_v10 = vld [vmem:[%s823_s1 + $0x18] sm:$0xff]  ;;  %v146_v11 = vld [vmem:[%s824_s2 + $0x28] sm:$0xff]  ;;  %s613_s30 = smov [#allocation3]   ;;  %vm486_vm2 = vcmask 122880  }
   0xe   :  { %94 = vperm.xlu0 %574, %v30_v6   ;;  %v29_v12 = vld [vmem:[%s823_s1] sm:$0xff]  ;;  %v142_v13 = vld [vmem:[%s824_s2 + $0x8] sm:$0xff]  ;;  %v215_v16 = vld [vmem:[%s826_s4 + $0x10] sm:$0xff]  ;;  %v78_v41 = vshrl.u32 %v77_v38, 7  ;;  %s494_s8 = sshll.u32 %s613_s30, 4  ;;  %s495_s8 = int_to_ptr.vmem [resolvable:$true] %s494_s8 }
   0xf   :  { %v145_v14 = vld [vmem:[%s824_s2 + $0x20] sm:$0xff]  ;;  %v144_v17 = vld [vmem:[%s824_s2 + $0x18] sm:$0xff]  ;;  %v143_v20 = vld [vmem:[%s824_s2 + $0x10] sm:$0xff]  ;;  %s589_s9 = scalar_lea.vmem %s495_s8, 16  ;;  %s593_s10 = scalar_lea.vmem %s495_s8, 32 }
  0x10   :  { %186 = vperm.xlu1 %577, %v148_v7   ;;  %v213_v15 = vld [vmem:[%s826_s4] sm:$0xff]  ;;  %v218_v21 = vld [vmem:[%s826_s4 + $0x28] sm:$0xff]  ;;  %v219_v23 = vld [vmem:[%s826_s4 + $0x30] sm:$0xff]  ;;  %v123_v43 = vsub.s32 1, %v78_v41  ;;  %v79_v45 = vsub.s32 0, %v78_v41  ;;  %p590_p0 = scmp.ne.s32.totalorder %s495_s8, %s589_s9  ;;  %p594_p1 = scmp.lt.s32.totalorder %s495_s8, %s495_s8 }
  0x11   :  { %v399_v18 = vld [vmem:[%s827_s5] sm:$0xff]  ;;  %v214_v26 = vld [vmem:[%s826_s4 + $0x8] sm:$0xff]  ;;  %v220_v27 = vld [vmem:[%s826_s4 + $0x38] sm:$0xff]  ;;  %p595_p2 = scmp.lt.s32.totalorder %s593_s10, %s589_s9 }
  0x12   :  { %582 = vset.pattern.permute.xlu0 %v612_v3  ;;  %v217_v19 = vld [vmem:[%s826_s4 + $0x20] sm:$0xff]  ;;  %v216_v28 = vld [vmem:[%s826_s4 + $0x18] sm:$0xff]  ;;  %v405_v29 = vld [vmem:[%s827_s5 + $0x30] sm:$0xff] }
  0x13   :  { %74 = vperm.xlu0 %582, %v36_v0   ;;  %v141_v22 = vld [vmem:[%s824_s2] sm:$0xff]  ;;  %v400_v30 = vld [vmem:[%s827_s5 + $0x8] sm:$0xff]  ;;  %v401_v31 = vld [vmem:[%s827_s5 + $0x10] sm:$0xff]  ;;  %p596_p3 = por %p595_p2, %p594_p1 }
  0x14   :  { %578 = vset.pattern.permute.xlu1 %v611_v2  ;;  %v205_v24 = vld [vmem:[%s825_s3] sm:$0xff]  ;;  %v402_v32 = vld [vmem:[%s827_s5 + $0x18] sm:$0xff]  ;;  %v404_v34 = vld [vmem:[%s827_s5 + $0x28] sm:$0xff] }
  0x15   :  { %106 = vperm.xlu1 %578, %v33_v8   ;;  %v209_v25 = vld [vmem:[%s825_s3 + $0x20] sm:$0xff]  ;;  %543 = vmatprep.mubr.msk.f32.mxu0 %vm261_vm0, %v205_v24  ;;  %v406_v35 = vld [vmem:[%s827_s5 + $0x38] sm:$0xff]  ;;  %p597_p4 = pnand %p596_p3, %p590_p0 }
  0x16   :  { %549 = vmatprep.mubr.msk.f32.mxu1 %vm261_vm0, %v209_v25  ;;  %v403_v33 = vld [vmem:[%s827_s5 + $0x20] sm:$0xff] }
  0x17   :  { %59 = vperm.xlu0 %582, %v33_v8   ;;  %v28_v47 = vld [vmem:[%s822_s0] sm:$0x3] }
  0x18   :  { %v763_v48 = vrot.slane %v28_v47, %v123_v43  ;;  %v765_v50 = vrot.slane %v28_v47, %v79_v45  ;;  %v206_v43 = vld [vmem:[%s825_s3 + $0x8] sm:$0xff]  ;;  %v207_v45 = vld [vmem:[%s825_s3 + $0x10] sm:$0xff]  ;;  %v208_v47 = vld [vmem:[%s825_s3 + $0x18] sm:$0xff] }
  0x19   :  { %579 = vset.pattern.permute.xlu1 %v612_v3 }
  0x1a   :  { %181 = vperm.xlu1 %579, %v147_v9  }
  0x1b   :  { %54 = vperm.xlu0 %582, %v32_v10  }
  0x1e   :  { %580 = vset.pattern.permute.xlu1 %v611_v2 }
  0x1f   :  { %102 = vperm.xlu1 %580, %v32_v10   ;;  %176 = vperm.xlu0 %582, %v146_v11  }
  0x23   :  { %581 = vset.pattern.permute.xlu1 %v612_v3  ;;  %39 = vperm.xlu0 %582, %v29_v12  }
  0x24   :  { %49 = vperm.xlu1 %581, %v31_v5  }
  0x27   :  { %156 = vperm.xlu0 %582, %v142_v13  }
  0x28   :  { %171 = vperm.xlu1 %581, %v145_v14  }
  0x2b   :  { %223 = vperm.xlu0 %582, %v213_v15  }
  0x2c   :  { %44 = vperm.xlu1 %581, %v30_v6  }
  0x2f   :  { %233 = vperm.xlu0 %582, %v215_v16  }
  0x30   :  { %166 = vperm.xlu1 %581, %v144_v17  }
  0x33   :  { %409 = vperm.xlu0 %582, %v399_v18  }
  0x34   :  { %583 = vset.pattern.permute.xlu1 %v611_v2 }
  0x35   :  { %90 = vperm.xlu1 %583, %v29_v12  }
  0x37   :  { %243 = vperm.xlu0 %582, %v217_v19  }
  0x39   :  { %584 = vset.pattern.permute.xlu1 %v612_v3 }
  0x3a   :  { %161 = vperm.xlu1 %584, %v143_v20  }
  0x3b   :  { %248 = vperm.xlu0 %582, %v218_v21  }
  0x3e   :  { %151 = vperm.xlu1 %584, %v141_v22  }
  0x3f   :  { %253 = vperm.xlu0 %582, %v219_v23  }
  0x42   :  { %228 = vperm.xlu1 %584, %v214_v26  }
  0x43   :  { %258 = vperm.xlu0 %582, %v220_v27  }
  0x46   :  { %238 = vperm.xlu1 %584, %v216_v28  }
  0x47   :  { %439 = vperm.xlu0 %582, %v405_v29  }
  0x4a   :  { %414 = vperm.xlu1 %584, %v400_v30  }
  0x4e   :  { %419 = vperm.xlu1 %584, %v401_v31  }
  0x52   :  { %424 = vperm.xlu1 %584, %v402_v32  }
  0x56   :  { %429 = vperm.xlu1 %584, %v403_v33  }
  0x5a   :  { %434 = vperm.xlu1 %584, %v404_v34  }
  0x5e   :  { %444 = vperm.xlu1 %584, %v406_v35  }
  0x7d   :  { %v70_v36 = vpop.permute.xlu1 %69  ;;  %v119_v37 = vpop.permute.xlu0 %118 }
  0x7e   :  { %v132_v51 = vmul.f32 %v763_v48, %v119_v37  ;;  %v87_v57 = vmul.f32 %v765_v50, %v70_v36 }
  0x81   :  { %v111_v39 = vpop.permute.xlu0 %110 }
  0x82   :  { %v115_v40 = vpop.permute.xlu1 %114  ;;  %v130_v61 = vmul.f32 %v763_v48, %v111_v39 }
  0x83   :  { %v131_v54 = vmul.f32 %v763_v48, %v115_v40 }
  0x85   :  { %v758_v42 = vpop.permute.xlu0 %98  ;;  %v139_v60 = vadd.f32 %v131_v54, %v87_v57 }
  0x86   :  { %v127_v28 = vmul.f32 %v763_v48, %v758_v42 }
  0x87   :  { %v65_v44 = vpop.permute.xlu1 %64 }
  0x88   :  { %v86_v62 = vmul.f32 %v765_v50, %v65_v44  ;;  %v210_v44 = vld [vmem:[%s825_s3 + $0x28] sm:$0xff] }
  0x89   :  { %v95_v46 = vpop.permute.xlu0 %94 }
  0x8a   :  { %v138_v4 = vadd.f32 %v130_v61, %v86_v62  ;;  %v126_v25 = vmul.f32 %v763_v48, %v95_v46  ;;  %v211_v46 = vld [vmem:[%s825_s3 + $0x30] sm:$0xff] }
  0x8b   :  { %v187_v49 = vpop.permute.xlu1 %186 }
  0x8e   :  { %v75_v52 = vpop.permute.xlu0 %74 }
  0x8f   :  { %v88_v53 = vmul.f32 %v765_v50, %v75_v52 }
  0x90   :  { %v107_v55 = vpop.permute.xlu1 %106 }
  0x91   :  { %v140_v56 = vadd.f32 %v132_v51, %v88_v53  ;;  %v129_v11 = vmul.f32 %v763_v48, %v107_v55 }
  0x92   :  { %v60_v58 = vpop.permute.xlu0 %59 }
  0x93   :  { %v196_v59 = vadd.f32 %v187_v49, %v140_v56  ;;  %v85_v9 = vmul.f32 %v765_v50, %v60_v58 }
  0x95   :  { %v204_v63 = vmax.f32 %v196_v59, 0.0  ;;  %v182_v0 = vpop.permute.xlu1 %181  ;;  %v137_v12 = vadd.f32 %v129_v11, %v85_v9 }
  0x96   :  { %v195_v1 = vadd.f32 %v182_v0, %v139_v60  ;;  %v55_v2 = vpop.permute.xlu0 %54 }
  0x97   :  { %527 = vmatprep.subr.mxu0 %v204_v63  ;;  %555 = vmatprep.subr.mxu1 %v204_v63  ;;  %v84_v15 = vmul.f32 %v765_v50, %v55_v2 }
  0x98   :  { %v203_v3 = vmax.f32 %v195_v1, 0.0  ;;  %528 = vmatpush3.msra.mxu0 %v204_v63  ;;  %563 = vmatpush3.msra.mxu1 %v204_v63 }
  0x9a   :  { %v103_v5 = vpop.permute.xlu1 %102  ;;  %v177_v6 = vpop.permute.xlu0 %176  ;;  %529 = vmatprep.subr.mxu0 %v203_v3  ;;  %556 = vmatprep.subr.mxu1 %v203_v3 }
  0x9b   :  { %v194_v7 = vadd.f32 %v177_v6, %v138_v4  ;;  %530 = vmatpush3.msra.mxu0 %v203_v3  ;;  %564 = vmatpush3.msra.mxu1 %v203_v3  ;;  %v128_v16 = vmul.f32 %v763_v48, %v103_v5 }
  0x9d   :  { %v202_v8 = vmax.f32 %v194_v7, 0.0  ;;  %v136_v19 = vadd.f32 %v128_v16, %v84_v15 }
  0x9e   :  { %v40_v24 = vpop.permute.xlu0 %39 }
  0x9f   :  { %v50_v10 = vpop.permute.xlu1 %49  ;;  %531 = vmatprep.subr.mxu0 %v202_v8  ;;  %557 = vmatprep.subr.mxu1 %v202_v8  ;;  %v81_v34 = vmul.f32 %v765_v50, %v40_v24 }
  0xa0   :  { %532 = vmatpush3.msra.mxu0 %v202_v8  ;;  %565 = vmatpush3.msra.mxu1 %v202_v8  ;;  %v83_v26 = vmul.f32 %v765_v50, %v50_v10 }
  0xa2   :  { %v135_v31 = vadd.f32 %v127_v28, %v83_v26  ;;  %v157_v32 = vpop.permute.xlu0 %156 }
  0xa3   :  { %v172_v13 = vpop.permute.xlu1 %171 }
  0xa4   :  { %v193_v14 = vadd.f32 %v172_v13, %v137_v12 }
  0xa6   :  { %v201_v17 = vmax.f32 %v193_v14, 0.0  ;;  %v224_v49 = vpop.permute.xlu0 %223 }
  0xa7   :  { %v45_v18 = vpop.permute.xlu1 %44 }
  0xa8   :  { %533 = vmatprep.subr.mxu0 %v201_v17  ;;  %558 = vmatprep.subr.mxu1 %v201_v17  ;;  %v82_v22 = vmul.f32 %v765_v50, %v45_v18 }
  0xa9   :  { %534 = vmatpush3.msra.mxu0 %v201_v17  ;;  %566 = vmatpush3.msra.mxu1 %v201_v17 }
  0xaa   :  { %v134_v29 = vadd.f32 %v126_v25, %v82_v22  ;;  %v234_v51 = vpop.permute.xlu0 %233 }
  0xab   :  { %v167_v20 = vpop.permute.xlu1 %166 }
  0xac   :  { %v192_v21 = vadd.f32 %v167_v20, %v136_v19  ;;  %v190_v35 = vadd.f32 %v157_v32, %v134_v29 }
  0xae   :  { %v200_v23 = vmax.f32 %v192_v21, 0.0  ;;  %v198_v40 = vmax.f32 %v190_v35, 0.0  ;;  %v410_v53 = vpop.permute.xlu0 %409 }
  0xb0   :  { %v91_v27 = vpop.permute.xlu1 %90  ;;  %535 = vmatprep.subr.mxu0 %v200_v23  ;;  %559 = vmatprep.subr.mxu1 %v200_v23 }
  0xb1   :  { %536 = vmatpush3.msra.mxu0 %v200_v23  ;;  %567 = vmatpush3.msra.mxu1 %v200_v23  ;;  %v125_v30 = vmul.f32 %v763_v48, %v91_v27  ;;  %v212_v48 = vld [vmem:[%s825_s3 + $0x38] sm:$0xff] }
  0xb2   :  { %v244_v55 = vpop.permute.xlu0 %243 }
  0xb3   :  { %v133_v38 = vadd.f32 %v125_v30, %v81_v34 }
  0xb5   :  { %v162_v33 = vpop.permute.xlu1 %161 }
  0xb6   :  { %v191_v36 = vadd.f32 %v162_v33, %v135_v31  ;;  %v249_v57 = vpop.permute.xlu0 %248 }
  0xb8   :  { %v199_v37 = vmax.f32 %v191_v36, 0.0 }
  0xb9   :  { %v152_v39 = vpop.permute.xlu1 %151 }
  0xba   :  { %v189_v41 = vadd.f32 %v152_v39, %v133_v38  ;;  %537 = vmatprep.subr.mxu0 %v199_v37  ;;  %560 = vmatprep.subr.mxu1 %v199_v37  ;;  %v254_v4 = vpop.permute.xlu0 %253 }
  0xbb   :  { %538 = vmatpush3.msra.mxu0 %v199_v37  ;;  %568 = vmatpush3.msra.mxu1 %v199_v37 }
  0xbc   :  { %v197_v42 = vmax.f32 %v189_v41, 0.0  ;;  %539 = vmatprep.subr.mxu0 %v198_v40  ;;  %561 = vmatprep.subr.mxu1 %v198_v40 }
  0xbd   :  { %540 = vmatpush3.msra.mxu0 %v198_v40  ;;  %569 = vmatpush3.msra.mxu1 %v198_v40  ;;  %v229_v50 = vpop.permute.xlu1 %228 }
  0xbe   :  { %541 = vmatprep.subr.mxu0 %v197_v42  ;;  %562 = vmatprep.subr.mxu1 %v197_v42  ;;  %v259_v20 = vpop.permute.xlu0 %258 }
  0xbf   :  { %542 = vmatpush3.msra.mxu0 %v197_v42  ;;  %570 = vmatpush3.msra.mxu1 %v197_v42 }
  0xc0   :  { %544 = vmatmul.mubr.msk.f32.vlgmr.msra.gmra.mxu0 %vm261_vm0, %v206_v43  ;;  %550 = vmatmul.mubr.msk.f32.vlgmr.msra.gmra.mxu1 %vm261_vm0, %v210_v44 }
  0xc1   :  { %546 = vmatprep.mubr.msk.f32.mxu0 %vm261_vm0, %v207_v45  ;;  %552 = vmatprep.mubr.msk.f32.mxu1 %vm261_vm0, %v211_v46  ;;  %v239_v52 = vpop.permute.xlu1 %238 }
  0xc2   :  { %v440_v35 = vpop.permute.xlu0 %439 }
  0xc4   :  { %547 = vmatmul.mubr.msk.f32.gmra.mxu0 %vm261_vm0, %v208_v47  ;;  %553 = vmatmul.mubr.msk.f32.gmra.mxu1 %vm261_vm0, %v212_v48 }
  0xc5   :  { %v415_v54 = vpop.permute.xlu1 %414 }
  0xc9   :  { %v420_v56 = vpop.permute.xlu1 %419 }
  0xcd   :  { %v425_v60 = vpop.permute.xlu1 %424 }
  0xd1   :  { %v430_v9 = vpop.permute.xlu1 %429 }
  0xd5   :  { %v435_v26 = vpop.permute.xlu1 %434 }
  0xd9   :  { %v445_v39 = vpop.permute.xlu1 %444 }
 0x180   :  { %v545_v58 = vpop.f32.mrf.mxu0  ;;  %v551_v59 = vpop.f32.mrf.mxu1 }
 0x181   :  { %v358_v61 = vadd.f32 %v545_v58, %v229_v50  ;;  %v378_v10 = vadd.f32 %v551_v59, %v249_v57 }
 0x182   :  { %v352_v62 = vpop.f32.mrf.mxu0  ;;  %v372_v63 = vpop.f32.mrf.mxu1 }
 0x183   :  { %v353_v0 = vadd.f32 %v352_v62, %v224_v49  ;;  %v392_v1 = vmax.f32 %v358_v61, 0.0  ;;  %v373_v6 = vadd.f32 %v372_v63, %v244_v55  ;;  %v396_v21 = vmax.f32 %v378_v10, 0.0 }
 0x184   :  { %v548_v2 = vpop.f32.mrf.mxu0  ;;  %v554_v3 = vpop.f32.mrf.mxu1 }
 0x185   :  { %v391_v5 = vmax.f32 %v353_v0, 0.0  ;;  %v368_v7 = vadd.f32 %v548_v2, %v239_v52  ;;  %v448_v13 = vmul.f32 %v415_v54, %v392_v1  ;;  %v395_v17 = vmax.f32 %v373_v6, 0.0 }
 0x186   :  { %v362_v8 = vpop.f32.mrf.mxu0  ;;  %v382_v12 = vpop.f32.mrf.mxu1  ;;  %v388_v24 = vadd.f32 %v554_v3, %v259_v20  ;;  %v452_v32 = vmul.f32 %v435_v26, %v396_v21 }
 0x187   :  { %v447_v11 = vmul.f32 %v410_v53, %v391_v5  ;;  %v394_v14 = vmax.f32 %v368_v7, 0.0  ;;  %v363_v15 = vadd.f32 %v362_v8, %v234_v51  ;;  %v383_v19 = vadd.f32 %v382_v12, %v254_v4 }
 0x188   :  { %v457_v22 = vsel %vm455_vm1, %v448_v13, 0.0  ;;  %v451_v28 = vmul.f32 %v430_v9, %v395_v17  ;;  %v398_v34 = vmax.f32 %v388_v24, 0.0  ;;  %v465_v41 = vsel %vm455_vm1, %v452_v32, 0.0 }
 0x189   :  { %v456_v16 = vsel %vm455_vm1, %v447_v11, 0.0  ;;  %v393_v18 = vmax.f32 %v363_v15, 0.0  ;;  %v450_v23 = vmul.f32 %v425_v60, %v394_v14  ;;  %v397_v30 = vmax.f32 %v383_v19, 0.0 }
 0x18a   :  { %v458_v27 = vadd.f32 %v457_v22, %v456_v16  ;;  %v463_v37 = vsel %vm455_vm1, %v451_v28, 0.0  ;;  %v454_v42 = vmul.f32 %v445_v39, %v398_v34  ;;  %v478_v53 = vstv %s828_s6 }
 0x18b   :  { %v449_v25 = vmul.f32 %v420_v56, %v393_v18  ;;  %v461_v33 = vsel %vm455_vm1, %v450_v23, 0.0  ;;  %v453_v38 = vmul.f32 %v440_v35, %v397_v30 }
 0x18c   :  { %v469_v46 = vsel %vm455_vm1, %v454_v42, 0.0 }
 0x18d   :  { %v459_v29 = vsel %vm455_vm1, %v449_v25, 0.0  ;;  %v467_v44 = vsel %vm455_vm1, %v453_v38, 0.0 }
 0x18e   :  { %v460_v31 = vadd.f32 %v459_v29, %v458_v27 }
 0x190   :  { %v462_v36 = vadd.f32 %v461_v33, %v460_v31 }
 0x192   :  { %v464_v40 = vadd.f32 %v463_v37, %v462_v36 }
 0x194   :  { %v466_v43 = vadd.f32 %v465_v41, %v464_v40 }
 0x196   :  { %v468_v45 = vadd.f32 %v467_v44, %v466_v43 }
 0x198   :  { %v470_v47 = vadd.f32 %v469_v46, %v468_v45 }
 0x19a   :  { %v471_v48 = vrot.slane %v470_v47, 4 }
 0x19c   :  { %v472_v49 = vadd.f32 %v471_v48, %v470_v47 }
 0x19e   :  { %v473_v50 = vrot.slane %v472_v49, 2 }
 0x1a0   :  { %v474_v51 = vadd.f32 %v473_v50, %v472_v49 }
 0x1a2   :  { %v475_v52 = vrot.slane %v474_v51, 1 }
 0x1a4   :  { %v476_v54 = vadd.f32 %v475_v52, %v474_v51 }
 0x1a6   :  { %v479_v55 = vadd.f32 %v478_v53, %v476_v54 }
 0x1a8   :  { %v510_v56 = vmul.f32 -1.442695, %v479_v55 }
 0x1aa   :  { %585 = vpow2.f32 %v510_v56 }
 0x1b7   :  { %v586_v57 = vpop.eup %585 }
 0x1b8   :  { %v483_v58 = vadd.f32 1.0, %v586_v57 }
 0x1ba   :  { %587 = vrcp.f32 %v483_v58 }
 0x1c7   :  { %v588_v59 = vpop.eup %587 }
 0x1c8   :  { %487 = vst.msk [vmem:[#allocation3] sm:$0x1] %vm486_vm2, %v588_v59 }
 0x1c9   :  { %600 = shalt.err (!%p597_p4)
}
 0x1ca   :  { %497 = dma.vmem_to_hbm [thread:$0]  %s495_s8, 16, %s829_s7, [#allocation4]  }
 0x1cb   :  { %609 = dma.done.wait [#allocation4], 16  }
 0x1cc   :  { %610 = vsyncadd [#allocation4], 4294967280 }
 0x1cd   :  { %501 = vsyncpa [#allocation4], 1 }

</bundles_post_ra>
